<compile_context>
chip_gen: v7x
topology: tpu7x:2x2x1
jax: 0.10.0
libtpu: 0.0.40
codegen_flags: <defaults>
</compile_context>

<pallas_src>
import jax
import jax.numpy as jnp
from jax.experimental import pallas as pl
from jax.experimental.pallas import tpu as pltpu


def relation_kernel(x_ref, w1_ref, b1_ref, w2_ref, b2_ref, o_ref):
    # x_ref : (TILE_N, D)  batch tile (f32 or bf16), streamed from HBM
    # w1_ref: (D, H)       fc1 weight (pre-transposed), resident across the grid
    # b1_ref: (1, H)       fc1 bias (f32)
    # w2_ref: (1, H)       fc2 weight as a row (f32)
    # b2_ref: (1, 1)       fc2 bias, SMEM scalar
    # o_ref : (1, TILE_N)  lane-dense output tile (f32)
    h = jnp.dot(x_ref[...], w1_ref[...], preferred_element_type=jnp.float32)
    h = jnp.maximum(h + b1_ref[...], 0.0)                      # ReLU in f32 (VPU)
    # fc2 as w2_row @ h.T -> (1, TILE_N): result lands directly on the lane axis,
    # avoiding both the wasteful (H, 1) weight block and a masked column store.
    y = jnp.dot(w2_ref[...], h.T, preferred_element_type=jnp.float32)
    o_ref[...] = jax.nn.sigmoid(y + b2_ref[0, 0]).astype(o_ref.dtype)


def _round_up(a: int, b: int) -> int:
    return ((a + b - 1) // b) * b


def relation_network(x, w1, b1, w2, b2, *, tile_n=512, input_dtype=None):
    """x: [N, D].  PyTorch layouts: w1 [H, D], b1 [H], w2 [1, H], b2 [1]."""
    N, D = x.shape
    H = w1.shape[0]

    # Batch tile: multiple of 128 rows, no larger than the 128-padded batch.
    tile_n = max(128, (min(tile_n, _round_up(N, 128)) // 128) * 128)
    n_pad = _round_up(N, tile_n)
    grid_n = n_pad // tile_n

    xp = x if n_pad == N else jnp.pad(x, ((0, n_pad - N), (0, 0)))
    if input_dtype is not None:          # e.g. jnp.bfloat16 on v6e / v7x (HBM-BW win)
        xp = xp.astype(input_dtype)
        w1 = w1.astype(input_dtype)

    w1t = jnp.transpose(w1)                         # (D, H)
    b1r = b1.reshape(1, H).astype(jnp.float32)      # (1, H)
    w2r = w2.reshape(1, H).astype(jnp.float32)      # (1, H) row
    b2r = b2.reshape(1, 1).astype(jnp.float32)      # (1, 1) -> SMEM scalar

    itemsize = jnp.dtype(xp.dtype).itemsize
    cost = pl.CostEstimate(
        flops=2 * n_pad * D * H + 2 * n_pad * H,
        transcendentals=n_pad,                       # one exp per sigmoid
        bytes_accessed=n_pad * D * itemsize + D * H * itemsize + n_pad * 4,
    )

    out = pl.pallas_call(
        relation_kernel,
        out_shape=jax.ShapeDtypeStruct((1, n_pad), jnp.float32),
        grid_spec=pltpu.PrefetchScalarGridSpec(
            num_scalar_prefetch=0,
            grid=(grid_n,),
            in_specs=[
                pl.BlockSpec((tile_n, D), lambda i: (i, 0)),          # x tile
                pl.BlockSpec((D, H), lambda i: (0, 0)),               # W1^T (resident)
                pl.BlockSpec((1, H), lambda i: (0, 0)),               # b1
                pl.BlockSpec((1, H), lambda i: (0, 0)),               # w2 row
                pl.BlockSpec(memory_space=pltpu.MemorySpace.SMEM),    # b2 scalar
            ],
            out_specs=pl.BlockSpec((1, tile_n), lambda i: (0, i)),    # lane-dense out
        ),
        compiler_params=pltpu.CompilerParams(
            dimension_semantics=("parallel",)),      # megacore: split batch across TCs
        cost_estimate=cost,
    )(xp, w1t, b1r, w2r, b2r)

    return out[0, :N].reshape(N, 1)


def relation_network_ref(x, w1, b1, w2, b2):
    h = jax.nn.relu(jnp.dot(x, w1.T, precision="highest") + b1)
    return jax.nn.sigmoid(jnp.dot(h, w2.T, precision="highest") + b2)


if __name__ == "__main__":
    # Small shapes consistent with the module: N relation pairs, features -> hidden -> 1.
    # N is deliberately NOT a multiple of the tile to exercise the ragged path.
    N = 1000
    INPUT_SIZE = 128
    HIDDEN_SIZE = 32

    key = jax.random.PRNGKey(0)
    kx, kw1, kb1, kw2, kb2 = jax.random.split(key, 5)

    x = jax.random.normal(kx, (N, INPUT_SIZE), dtype=jnp.float32)
    # PyTorch Linear shapes: weight [out, in], bias [out]
    w1 = jax.random.normal(kw1, (HIDDEN_SIZE, INPUT_SIZE), jnp.float32) * 0.05
    b1 = jax.random.normal(kb1, (HIDDEN_SIZE,), jnp.float32) * 0.05
    w2 = jax.random.normal(kw2, (1, HIDDEN_SIZE), jnp.float32) * 0.05
    b2 = jax.random.normal(kb2, (1,), jnp.float32) * 0.05

    ref = relation_network_ref(x, w1, b1, w2, b2)

    # f32 path (tile_n=512 -> 2 grid steps after padding 1000 -> 1024 rows).
    out = jax.block_until_ready(relation_network(x, w1, b1, w2, b2, tile_n=512))
    assert out.shape == (N, 1)
    assert jnp.allclose(out, ref, atol=2e-3, rtol=2e-3), "f32 kernel mismatch vs reference"

    # bf16-input path (v6e/v7x bandwidth optimization); accumulation stays f32.
    out_bf16 = jax.block_until_ready(
        relation_network(x, w1, b1, w2, b2, tile_n=512, input_dtype=jnp.bfloat16))
    assert out_bf16.shape == (N, 1)
    assert jnp.allclose(out_bf16, ref, atol=3e-2, rtol=3e-2), "bf16 kernel mismatch vs reference"

    print("KERNEL_OK")
</pallas_src>

<mosaic_0001>
module attributes {stable_mosaic.version = 11 : i64} {
  func.func @relation_kernel(%arg0: i32, %arg1: memref<512x128xf32, #tpu.memory_space<vmem>>, %arg2: memref<128x32xf32, #tpu.memory_space<vmem>>, %arg3: memref<1x32xf32, #tpu.memory_space<vmem>>, %arg4: memref<1x32xf32, #tpu.memory_space<vmem>>, %arg5: memref<1x1xf32, #tpu.memory_space<smem>>, %arg6: memref<1x512xf32, #tpu.memory_space<vmem>>) attributes {dimension_semantics = [#tpu.dimension_semantics<parallel>], iteration_bounds = array<i64: 2>, scalar_prefetch = 0 : i64, scratch_operands = 0 : i64, tpu.core_type = #tpu.core_type<tc>, window_params = [{transform_indices = @transform_0, window_bounds = array<i64: 512, 128>}, {pipeline_mode = #tpu.pipeline_mode<synchronous>, transform_indices = @transform_1, window_bounds = array<i64: 128, 32>}, {pipeline_mode = #tpu.pipeline_mode<synchronous>, transform_indices = @transform_2, window_bounds = array<i64: 1, 32>}, {pipeline_mode = #tpu.pipeline_mode<synchronous>, transform_indices = @transform_3, window_bounds = array<i64: 1, 32>}, {transform_indices = @transform_4, window_bounds = array<i64: 1, 1>}, {transform_indices = @transform_5, window_bounds = array<i64: 1, 512>}]} {
    %c0 = arith.constant 0 : index
    %c0_0 = arith.constant 0 : index
    %0 = vector.load %arg1[%c0, %c0_0] : memref<512x128xf32, #tpu.memory_space<vmem>>, vector<512x128xf32>
    %c0_1 = arith.constant 0 : index
    %c0_2 = arith.constant 0 : index
    %1 = vector.load %arg2[%c0_1, %c0_2] : memref<128x32xf32, #tpu.memory_space<vmem>>, vector<128x32xf32>
    %cst = arith.constant dense<0.000000e+00> : vector<512x32xf32>
    %2 = tpu.matmul %0, %1, %cst {dimension_numbers = #tpu.dot_dimension_numbers<[1], [0], [0], [1], [0, 0, 1, 1], [], []>} : vector<512x128xf32>, vector<128x32xf32>, vector<512x32xf32> -> vector<512x32xf32>
    %c0_3 = arith.constant 0 : index
    %c0_4 = arith.constant 0 : index
    %3 = vector.load %arg3[%c0_3, %c0_4] : memref<1x32xf32, #tpu.memory_space<vmem>>, vector<1x32xf32>
    %4 = vector.broadcast %3 : vector<1x32xf32> to vector<512x32xf32>
    %5 = arith.addf %2, %4 : vector<512x32xf32>
    %cst_5 = arith.constant 0.000000e+00 : f32
    %6 = vector.broadcast %cst_5 : f32 to vector<512x32xf32>
    %7 = arith.maximumf %5, %6 : vector<512x32xf32>
    %c0_6 = arith.constant 0 : index
    %c0_7 = arith.constant 0 : index
    %8 = vector.load %arg4[%c0_6, %c0_7] : memref<1x32xf32, #tpu.memory_space<vmem>>, vector<1x32xf32>
    %9 = tpu.transpose %7, [1, 0] : vector<512x32xf32> -> vector<32x512xf32>
    %cst_8 = arith.constant dense<0.000000e+00> : vector<1x512xf32>
    %10 = tpu.matmul %8, %9, %cst_8 {dimension_numbers = #tpu.dot_dimension_numbers<[1], [0], [0], [1], [0, 0, 1, 1], [], []>} : vector<1x32xf32>, vector<32x512xf32>, vector<1x512xf32> -> vector<1x512xf32>
    %c0_9 = arith.constant 0 : index
    %c0_10 = arith.constant 0 : index
    %11 = memref.load %arg5[%c0_9, %c0_10] : memref<1x1xf32, #tpu.memory_space<smem>>
    %12 = vector.broadcast %11 : f32 to vector<1x512xf32>
    %13 = arith.addf %10, %12 : vector<1x512xf32>
    %14 = arith.negf %13 : vector<1x512xf32>
    %15 = math.exp %14 : vector<1x512xf32>
    %cst_11 = arith.constant 1.000000e+00 : f32
    %16 = vector.broadcast %cst_11 : f32 to vector<1x512xf32>
    %17 = arith.addf %16, %15 : vector<1x512xf32>
    %18 = arith.divf %16, %17 : vector<1x512xf32>
    %c0_12 = arith.constant 0 : index
    %c0_13 = arith.constant 0 : index
    %19 = vector.load %arg6[%c0_12, %c0_13] : memref<1x512xf32, #tpu.memory_space<vmem>>, vector<1x512xf32>
    tpu.vector_store %arg6[%c0_12, %c0_13], %18 {strides = array<i32>} : memref<1x512xf32, #tpu.memory_space<vmem>>, vector<1x512xf32>,
    return
  }
  func.func @transform_0(%arg0: i32) -> (i32, i32) {
    %c0_i32 = arith.constant 0 : i32
    %c0_i32_0 = arith.constant 0 : i32
    return %arg0, %c0_i32 : i32, i32
  }
  func.func @transform_1(%arg0: i32) -> (i32, i32) {
    %c0_i32 = arith.constant 0 : i32
    %c0_i32_0 = arith.constant 0 : i32
    %c0_i32_1 = arith.constant 0 : i32
    return %c0_i32, %c0_i32_0 : i32, i32
  }
  func.func @transform_2(%arg0: i32) -> (i32, i32) {
    %c0_i32 = arith.constant 0 : i32
    %c0_i32_0 = arith.constant 0 : i32
    %c0_i32_1 = arith.constant 0 : i32
    return %c0_i32, %c0_i32_0 : i32, i32
  }
  func.func @transform_3(%arg0: i32) -> (i32, i32) {
    %c0_i32 = arith.constant 0 : i32
    %c0_i32_0 = arith.constant 0 : i32
    %c0_i32_1 = arith.constant 0 : i32
    return %c0_i32, %c0_i32_0 : i32, i32
  }
  func.func @transform_4(%arg0: i32) -> (i32, i32) {
    %c0_i32 = arith.constant 0 : i32
    %c0_i32_0 = arith.constant 0 : i32
    %c0_i32_1 = arith.constant 0 : i32
    return %c0_i32, %c0_i32_0 : i32, i32
  }
  func.func @transform_5(%arg0: i32) -> (i32, i32) {
    %c0_i32 = arith.constant 0 : i32
    %c0_i32_0 = arith.constant 0 : i32
    return %c0_i32, %arg0 : i32, i32
  }
}

</mosaic_0001>

<bundles_post_ra>
// kernel: tpu_custom_call.1
= control target key start
LH: loop header
LB: loop body
LE: loop exit
PB: predicated region body
PF: predicated region fallthrough
CT: control target
= control target key end

     0   :  { %s2433_s0 = inlined_call_operand.hbm [shape: f32[1024,128], index: 0, kind: input, shape index: {}]   ;;  %s2434_s1 = inlined_call_operand.vmem [shape: f32[128,32], index: 1, kind: input, shape index: {}]   ;;  %s2435_s2 = inlined_call_operand.vmem [shape: f32[1,32], index: 2, kind: input, shape index: {}]   ;;  %s2436_s3 = inlined_call_operand.vmem [shape: f32[1,32], index: 3, kind: input, shape index: {}]   ;;  %s2437_s4 = inlined_call_operand.<no memory space> [shape: f32[1,1], index: 4, kind: input, shape index: {}]   ;;  %s2438_s5 = inlined_call_operand.hbm [shape: f32[1,1024], index: 5, kind: output, shape index: {}]  }
   0x1   :  { %10 = sst [smem:[#allocation2]] %s2437_s4 }
   0x2   :  { %11 = vsyncpa [#allocation4], 0 }
   0x3   :  { %13 = vsyncpa [#allocation4 + $0x1], 0 }
   0x4   :  { %14 = vsyncpa [#allocation5], 0 }
   0x5   :  { %16 = vsyncpa [#allocation5 + $0x1], 0  ;;  %s1958_s20 = smov 0   ;;  %s1960_s21 = smov 0  }
   0x6   :  { %s1962_s22 = smov 0   ;;  %s1964_s23 = smov 0  }
   0x7 LB: > { %s1979_s4 = sadd.s32 4294967295, %s1918_s23   ;;  %s1266_s24 = sadd.s32 4294967294, %s1918_s23   ;;  %s1918_s23 = sphi %s1964_s23, %s2453_s23   ;;  %s1914_s22 = sphi %s1962_s22, %s2452_s22   ;;  %s1910_s21 = sphi %s1960_s21, %s2451_s21   ;;  %s1906_s20 = sphi %s1958_s20, %s2450_s20  }
   0x8   : > { %s1983_s25 = sadd.s32 1, %s1918_s23   ;;  %s29_s26 = sadd.s32 1, %s1914_s22 }
   0x9   : > { %s26_s27 = ssub.s32 %s1918_s23, %s1983_s25  ;;  %p36_p0 = scmp.ne.s32.totalorder %s1914_s22, %s1910_s21 }
   0xa   : > { %p27_p1 = scmp.eq.s32.totalorder %s26_s27, 0  ;;  %p37_p2 = scmp.eq.s32.totalorder %s1918_s23, 0 }
   0xb   : > { %p42_p3 = scmp.ne.s32.totalorder %s1910_s21, %s1906_s20  ;;  %p43_p4 = scmp.eq.s32.totalorder %s1979_s4, 0 }
   0xc   : > { %s1995_s28 = scalar_select %p27_p1, %s1914_s22, %s29_s26  }
   0xd   : > { %p1997_p5 = por %p37_p2, %p36_p0  ;;  %p2001_p6 = por %p43_p4, %p42_p3 }
   0xe   : > { %p150_p7 = scmp.eq.s32.totalorder %s1979_s4, 1  ;;  %p156_p8 = scmp.eq.s32.totalorder %s1266_s24, 1 }
   0xf   : > { %p1769_p10 = scmp.lt.s32.totalorder %s1918_s23, 2  ;;  %s188_s8 = sand.u32 1, %s1914_s22  }
  0x10   : > { %p2008_p11 = por %p150_p7, %p36_p0  ;;  %p2012_p12 = por %p156_p8, %p42_p3 }
  0x11   : > { %s1351_s9 = sshll.u32 %s1918_s23, 13  ;;  %s1269_s10 = sshll.u32 %s188_s8, 9 }
  0x12   : > { %s2442_s6 = scalar_select %p2008_p11, 1, 0 }
  0x13   : > { %s2443_s7 = scalar_select %p2012_p12, 1, 0 }
  0x14   : > { %s2021_s13 = scalar_lea.hbm %s2433_s0, %s1351_s9  ;;  %s192_s14 = scalar_lea.vmem [#allocation3], %s1269_s10 }
  0x15   : > { %s199_s15 = sshll.u32 %s192_s14, 4  ;;  %p2025_p13 = pnand %p1769_p10, %p1997_p5  ;;  %s2029_s15 = int_to_ptr.vmem [resolvable:$true] %s199_s15 }
  0x16   : > { %s2031_s17 = scalar_lea.sflag [#allocation4], %s188_s8  ;;  %s1822_s18 = scalar_lea.hbm %s2021_s13, 8192 }
  0x17   : > { %p1823_p0 = scmp.ne.s32.totalorder %s2021_s13, %s1822_s18  ;;  %p1824_p1 = pneg %p2025_p13 }
  0x18   : > { %s1827_s26 = scalar_lea.hbm %s2433_s0, 16384  ;;  %p1828_p4 = scmp.lt.u32.totalorder %s2021_s13, %s2433_s0 }
  0x19   : > { %p1825_p2 = pnand %p1824_p1, %p1823_p0  ;;  %p1829_p5 = scmp.lt.u32.totalorder %s1827_s26, %s1822_s18 }
  0x1a   : > { %p1831_p8 = scmp.lt.u32.totalorder %s1822_s18, %s2021_s13 }
  0x1b   : > { %p1826_p3 = pneg %p1825_p2  ;;  %p1830_p7 = por %p1829_p5, %p1828_p4 }
  0x1d   : > { %p1832_p10 = por %p1831_p8, %p1830_p7 }
  0x1f   : > { %p1833_p9 = pnand %p1832_p10, %p1826_p3 }
  0x21   : > { %1836 = shalt.err (!%p1833_p9)
}
  0x22   : > { %s1837_s8 = scalar_lea.vmem %s2029_s15, 8192  ;;  %s1920_s9 = smov [#allocation3]  }
  0x23   : > { %p1838_p0 = scmp.ne.s32.totalorder %s2029_s15, %s1837_s8  ;;  %s1842_s10 = sshll.u32 %s1920_s9, 4  ;;  %s1843_s10 = int_to_ptr.vmem [resolvable:$false] %s1842_s10 }
  0x24   : > { %s1844_s11 = scalar_lea.vmem %s1843_s10, 16384  ;;  %p1845_p11 = scmp.lt.s32.totalorder %s2029_s15, %s1843_s10 }
  0x25   : > { %p1840_p2 = pnand %p1838_p0, %p1824_p1  ;;  %p1846_p4 = scmp.lt.s32.totalorder %s1844_s11, %s1837_s8 }
  0x27   : > { %p1841_p12 = pneg %p1840_p2  ;;  %p1847_p5 = por %p1846_p4, %p1845_p11 }
  0x29   : > { %p1848_p7 = pnand %p1847_p5, %p1841_p12 }
  0x2b   : > { %1851 = shalt.err (!%p1848_p7)
}
  0x2c   : > { %s1921_s12 = smov 128   ;;  %s1922_s14 = smov 8  }
  0x2d   : > { %1764 = dma.hbm_to_vmem [thread:$0]  (!%p2025_p13), %s2021_s13, 8192, %s2029_s15, %s2031_s17, %s1921_s12, %s1921_s12, %s1922_s14  }
  0x2e   : > { %p1272_p9 = scmp.ge.s32.totalorder %s1918_s23, 1  ;;  %p207_p1 = scmp.lt.s32.totalorder %s1918_s23, 3 }
  0x30   : > { %p208_p3 = pnand %p1272_p9, %p207_p1 }
  0x31   : > { %s2062_s18 = sand.u32 (!%p208_p3), 1, %s1910_s21  }
  0x32   : > { %211 = sbr.rel (%p208_p3) target bundleno = 735 (0x2df), region = 40  ;;  %s1273_s19 = sshll.u32 (!%p208_p3), %s2062_s18, 9 }
  0x33   : > { %s214_s24 = scalar_lea.sflag (!%p208_p3), [#allocation4], %s2062_s18  ;;  %s2066_s26 = scalar_lea.vmem (!%p208_p3), [#allocation3], %s1273_s19 }
  0x39   : > { %1897 = dma.done.wait (%p2001_p6), %s214_s24, 8192  }
  0x3a   : > { %1899 = vsyncadd (%p2001_p6), %s214_s24, 4294959104  ;;  %v310_v0 = vld [vmem:[%s2434_s1] sm:$0xff]  ;;  %v311_v1 = vld [vmem:[%s2434_s1 + $0x8] sm:$0xff]  ;;  %vm785_vm0 = vcmask 261120   ;;  %s1274_s8 = sshll.u32 %s2062_s18, 2  ;;  %s1352_s9 = sshll.u32 %s1979_s4, 6 }
  0x3b   : > { %v312_v2 = vld [vmem:[%s2434_s1 + $0x10] sm:$0xff]  ;;  %v1629_v3 = vpack.c.bf16 %v311_v1, %v310_v0  ;;  %v313_v4 = vld [vmem:[%s2434_s1 + $0x18] sm:$0xff]  ;;  %v314_v6 = vld [vmem:[%s2434_s1 + $0x20] sm:$0xff]  ;;  %s243_s30 = scalar_lea.vmem [#allocation6], %s1274_s8  ;;  %s2389_s14 = scalar_lea.hbm %s2438_s5, %s1352_s9 }
  0x3c   : > { %v1633_v5 = vpack.c.bf16 %v313_v4, %v312_v2  ;;  %v315_v7 = vld [vmem:[%s2434_s1 + $0x28] sm:$0xff]  ;;  %v246_v9 = vld [vmem:[%s2066_s26] sm:$0xff]  ;;  %v316_v10 = vld [vmem:[%s2434_s1 + $0x30] sm:$0xff]  ;;  %s1196_s10 = sshll.u32 %s243_s30, 4  ;;  %s1182_s19 = scalar_lea.sflag [#allocation5], %s2062_s18  ;;  %s2391_s10 = int_to_ptr.vmem [resolvable:$true] %s1196_s10 }
  0x3d   : > { %1630 = vmatprep.subr.bf16.mxu0 %v1629_v3  ;;  %v1637_v8 = vpack.c.bf16 %v315_v7, %v314_v6  ;;  %v317_v11 = vld [vmem:[%s2434_s1 + $0x38] sm:$0xff]  ;;  %1533 = vmatprep.mubr.f32.mxu0 %v246_v9  ;;  %v318_v13 = vld [vmem:[%s2434_s1 + $0x40] sm:$0xff]  ;;  %v319_v14 = vld [vmem:[%s2434_s1 + $0x48] sm:$0xff]  ;;  %s1852_s24 = scalar_lea.vmem %s2391_s10, 64  ;;  %p2447_p11 = scmp.ne.s32.totalorder %s2442_s6, 0 }
  0x3e   : > { %1632 = vmatpush3.bf16.msra.mxu0 %v1629_v3  ;;  %v1641_v12 = vpack.c.bf16 %v317_v11, %v316_v10  ;;  %v1645_v15 = vpack.c.bf16 %v319_v14, %v318_v13  ;;  %v320_v16 = vld [vmem:[%s2434_s1 + $0x50] sm:$0xff]  ;;  %v321_v17 = vld [vmem:[%s2434_s1 + $0x58] sm:$0xff]  ;;  %v322_v19 = vld [vmem:[%s2434_s1 + $0x60] sm:$0xff]  ;;  %p1853_p6 = scmp.ne.s32.totalorder %s2391_s10, %s1852_s24  ;;  %s1924_s4 = smov [#allocation6]  }
  0x3f   : > { %1634 = vmatprep.subr.bf16.mxu0 %v1633_v5  ;;  %v1649_v18 = vpack.c.bf16 %v321_v17, %v320_v16  ;;  %v323_v20 = vld [vmem:[%s2434_s1 + $0x68] sm:$0xff]  ;;  %v324_v22 = vld [vmem:[%s2434_s1 + $0x70] sm:$0xff]  ;;  %v325_v23 = vld [vmem:[%s2434_s1 + $0x78] sm:$0xff]  ;;  %s1856_s13 = sshll.u32 %s1924_s4, 4  ;;  %s1857_s13 = int_to_ptr.vmem [resolvable:$false] %s1856_s13 }
  0x40   : > { %v1653_v21 = vpack.c.bf16 %v323_v20, %v322_v19  ;;  %v1657_v24 = vpack.c.bf16 %v325_v23, %v324_v22  ;;  %v247_v25 = vld [vmem:[%s2066_s26 + $0x8] sm:$0xff]  ;;  %v248_v26 = vld [vmem:[%s2066_s26 + $0x10] sm:$0xff]  ;;  %v249_v27 = vld [vmem:[%s2066_s26 + $0x18] sm:$0xff]  ;;  %p1854_p12 = pnand %p1853_p6, %p2447_p11  ;;  %s1858_s15 = scalar_lea.vmem %s1857_s13, 128 }
  0x41   : > { %v250_v28 = vld [vmem:[%s2066_s26 + $0x20] sm:$0xff]  ;;  %v251_v29 = vld [vmem:[%s2066_s26 + $0x28] sm:$0xff]  ;;  %v252_v30 = vld [vmem:[%s2066_s26 + $0x30] sm:$0xff]  ;;  %p1859_p8 = scmp.lt.s32.totalorder %s2391_s10, %s1857_s13  ;;  %p1860_p10 = scmp.lt.s32.totalorder %s1858_s15, %s1852_s24 }
  0x42   : > { %1636 = vmatpush3.bf16.msra.mxu0 %v1633_v5  ;;  %v253_v31 = vld [vmem:[%s2066_s26 + $0x38] sm:$0xff]  ;;  %v254_v32 = vld [vmem:[%s2066_s26 + $0x40] sm:$0xff]  ;;  %v255_v33 = vld [vmem:[%s2066_s26 + $0x48] sm:$0xff]  ;;  %p1855_p13 = pneg %p1854_p12 }
  0x43   : > { %1638 = vmatprep.subr.bf16.mxu0 %v1637_v8  ;;  %v256_v34 = vld [vmem:[%s2066_s26 + $0x50] sm:$0xff]  ;;  %v257_v35 = vld [vmem:[%s2066_s26 + $0x58] sm:$0xff]  ;;  %v258_v36 = vld [vmem:[%s2066_s26 + $0x60] sm:$0xff]  ;;  %p1861_p0 = por %p1860_p10, %p1859_p8 }
  0x44   : > { %v259_v37 = vld [vmem:[%s2066_s26 + $0x68] sm:$0xff]  ;;  %v260_v38 = vld [vmem:[%s2066_s26 + $0x70] sm:$0xff]  ;;  %v261_v39 = vld [vmem:[%s2066_s26 + $0x78] sm:$0xff] }
  0x45   : > { %v262_v40 = vld [vmem:[%s2066_s26 + $0x80] sm:$0xff]  ;;  %v263_v41 = vld [vmem:[%s2066_s26 + $0x88] sm:$0xff]  ;;  %v264_v42 = vld [vmem:[%s2066_s26 + $0x90] sm:$0xff]  ;;  %p1862_p2 = pnand %p1861_p0, %p1855_p13 }
  0x46   : > { %1640 = vmatpush3.bf16.msra.mxu0 %v1637_v8  ;;  %v265_v43 = vld [vmem:[%s2066_s26 + $0x98] sm:$0xff]  ;;  %v266_v44 = vld [vmem:[%s2066_s26 + $0xa0] sm:$0xff]  ;;  %v267_v45 = vld [vmem:[%s2066_s26 + $0xa8] sm:$0xff] }
  0x47   : > { %1642 = vmatprep.subr.bf16.mxu0 %v1641_v12  ;;  %v268_v46 = vld [vmem:[%s2066_s26 + $0xb0] sm:$0xff]  ;;  %v269_v47 = vld [vmem:[%s2066_s26 + $0xb8] sm:$0xff]  ;;  %v270_v48 = vld [vmem:[%s2066_s26 + $0xc0] sm:$0xff] }
  0x48   : > { %v271_v49 = vld [vmem:[%s2066_s26 + $0xc8] sm:$0xff]  ;;  %v272_v50 = vld [vmem:[%s2066_s26 + $0xd0] sm:$0xff]  ;;  %v273_v51 = vld [vmem:[%s2066_s26 + $0xd8] sm:$0xff] }
  0x49   : > { %v274_v52 = vld [vmem:[%s2066_s26 + $0xe0] sm:$0xff]  ;;  %v275_v53 = vld [vmem:[%s2066_s26 + $0xe8] sm:$0xff]  ;;  %v276_v54 = vld [vmem:[%s2066_s26 + $0xf0] sm:$0xff] }
  0x4a   : > { %1644 = vmatpush3.bf16.msra.mxu0 %v1641_v12  ;;  %v277_v55 = vld [vmem:[%s2066_s26 + $0xf8] sm:$0xff]  ;;  %v278_v56 = vld [vmem:[%s2066_s26 + $0x100] sm:$0xff]  ;;  %v279_v57 = vld [vmem:[%s2066_s26 + $0x108] sm:$0xff] }
  0x4b   : > { %1646 = vmatprep.subr.bf16.mxu0 %v1645_v15  ;;  %v280_v58 = vld [vmem:[%s2066_s26 + $0x110] sm:$0xff]  ;;  %v281_v59 = vld [vmem:[%s2066_s26 + $0x118] sm:$0xff]  ;;  %v282_v60 = vld [vmem:[%s2066_s26 + $0x120] sm:$0xff] }
  0x4c   : > { %v283_v61 = vld [vmem:[%s2066_s26 + $0x128] sm:$0xff]  ;;  %v284_v62 = vld [vmem:[%s2066_s26 + $0x130] sm:$0xff]  ;;  %v285_v63 = vld [vmem:[%s2066_s26 + $0x138] sm:$0xff] }
  0x4d   : > { %v286_v0 = vld [vmem:[%s2066_s26 + $0x140] sm:$0xff]  ;;  %v287_v1 = vld [vmem:[%s2066_s26 + $0x148] sm:$0xff]  ;;  %v288_v2 = vld [vmem:[%s2066_s26 + $0x150] sm:$0xff] }
  0x4e   : > { %1648 = vmatpush3.bf16.msra.mxu0 %v1645_v15  ;;  %v289_v3 = vld [vmem:[%s2066_s26 + $0x158] sm:$0xff]  ;;  %v290_v4 = vld [vmem:[%s2066_s26 + $0x160] sm:$0xff]  ;;  %v291_v5 = vld [vmem:[%s2066_s26 + $0x168] sm:$0xff] }
  0x4f   : > { %1650 = vmatprep.subr.bf16.mxu0 %v1649_v18  ;;  %v292_v6 = vld [vmem:[%s2066_s26 + $0x170] sm:$0xff]  ;;  %v293_v7 = vld [vmem:[%s2066_s26 + $0x178] sm:$0xff]  ;;  %v294_v8 = vld [vmem:[%s2066_s26 + $0x180] sm:$0xff] }
  0x50   : > { %v295_v9 = vld [vmem:[%s2066_s26 + $0x188] sm:$0xff]  ;;  %v296_v10 = vld [vmem:[%s2066_s26 + $0x190] sm:$0xff]  ;;  %v297_v11 = vld [vmem:[%s2066_s26 + $0x198] sm:$0xff] }
  0x51   : > { %v298_v12 = vld [vmem:[%s2066_s26 + $0x1a0] sm:$0xff]  ;;  %v299_v13 = vld [vmem:[%s2066_s26 + $0x1a8] sm:$0xff]  ;;  %v300_v14 = vld [vmem:[%s2066_s26 + $0x1b0] sm:$0xff] }
  0x52   : > { %1652 = vmatpush3.bf16.msra.mxu0 %v1649_v18  ;;  %v301_v15 = vld [vmem:[%s2066_s26 + $0x1b8] sm:$0xff]  ;;  %v302_v16 = vld [vmem:[%s2066_s26 + $0x1c0] sm:$0xff]  ;;  %v303_v17 = vld [vmem:[%s2066_s26 + $0x1c8] sm:$0xff] }
  0x53   : > { %1654 = vmatprep.subr.bf16.mxu0 %v1653_v21  ;;  %v304_v18 = vld [vmem:[%s2066_s26 + $0x1d0] sm:$0xff]  ;;  %v305_v19 = vld [vmem:[%s2066_s26 + $0x1d8] sm:$0xff]  ;;  %v306_v20 = vld [vmem:[%s2066_s26 + $0x1e0] sm:$0xff] }
  0x54   : > { %v308_v22 = vld [vmem:[%s2066_s26 + $0x1f0] sm:$0xff]  ;;  %v309_v23 = vld [vmem:[%s2066_s26 + $0x1f8] sm:$0xff]  ;;  %vm2233_vm1 = vmpackc.low %vm785_vm0, %vm785_vm0 }
  0x56   : > { %1656 = vmatpush3.bf16.msra.mxu0 %v1653_v21  ;;  %v307_v21 = vld [vmem:[%s2066_s26 + $0x1e8] sm:$0xff]  ;;  %s783_s26 = sld [smem:[#allocation2]] }
  0x57   : > { %1658 = vmatprep.subr.bf16.mxu0 %v1657_v24 }
  0x5a   : > { %1660 = vmatpush3.bf16.msra.mxu0 %v1657_v24  ;;  %v2187_v24 = vld [vmem:[%s2436_s3] sm:$0x1] }
  0x5b   : > { %1465 = vmatprep.mubr.msk.f32.mxu1 %vm785_vm0, %v2187_v24 }
  0x5d   : > { %1534 = vmatmul.mubr.f32.vlgmr.msra.gmra.mrb[0].mxu0 %v247_v25  ;;  %v2194_v25 = vld [vmem:[%s2435_s2] ss:$0 sm:$0xff] }
  0x5e   : > { %1536 = vmatprep.mubr.f32.mxu0 %v248_v26 }
  0x61   : > { %1537 = vmatmul.mubr.f32.gmra.mrb[2].mxu0 %v249_v27 }
  0x62   : > { %1539 = vmatprep.mubr.f32.mxu0 %v250_v28 }
  0x65   : > { %1540 = vmatmul.mubr.f32.gmra.mrb[4].mxu0 %v251_v29 }
  0x66   : > { %1542 = vmatprep.mubr.f32.mxu0 %v252_v30 }
  0x69   : > { %1543 = vmatmul.mubr.f32.gmra.mrb[6].mxu0 %v253_v31 }
  0x6a   : > { %1545 = vmatprep.mubr.f32.mxu0 %v254_v32 }
  0x6d   : > { %1546 = vmatmul.mubr.f32.gmra.mrb[8].mxu0 %v255_v33 }
  0x6e   : > { %1548 = vmatprep.mubr.f32.mxu0 %v256_v34 }
  0x71   : > { %1549 = vmatmul.mubr.f32.gmra.mrb[10].mxu0 %v257_v35 }
  0x72   : > { %1551 = vmatprep.mubr.f32.mxu0 %v258_v36 }
  0x75   : > { %1552 = vmatmul.mubr.f32.gmra.mrb[12].mxu0 %v259_v37 }
  0x76   : > { %1554 = vmatprep.mubr.f32.mxu0 %v260_v38 }
  0x79   : > { %1555 = vmatmul.mubr.f32.gmra.mrb[14].mxu0 %v261_v39 }
  0x7a   : > { %1557 = vmatprep.mubr.f32.mxu0 %v262_v40 }
  0x7d   : > { %1558 = vmatmul.mubr.f32.gmra.mrb[16].mxu0 %v263_v41 }
  0x7e   : > { %1560 = vmatprep.mubr.f32.mxu0 %v264_v42 }
  0x81   : > { %1561 = vmatmul.mubr.f32.gmra.mrb[18].mxu0 %v265_v43 }
  0x82   : > { %1563 = vmatprep.mubr.f32.mxu0 %v266_v44 }
  0x85   : > { %1564 = vmatmul.mubr.f32.gmra.mrb[20].mxu0 %v267_v45 }
  0x86   : > { %1566 = vmatprep.mubr.f32.mxu0 %v268_v46 }
  0x89   : > { %1567 = vmatmul.mubr.f32.gmra.mrb[22].mxu0 %v269_v47 }
  0x8a   : > { %1569 = vmatprep.mubr.f32.mxu0 %v270_v48 }
  0x8d   : > { %1570 = vmatmul.mubr.f32.gmra.mrb[24].mxu0 %v271_v49 }
  0x8e   : > { %1572 = vmatprep.mubr.f32.mxu0 %v272_v50 }
  0x91   : > { %1573 = vmatmul.mubr.f32.gmra.mrb[26].mxu0 %v273_v51 }
  0x92   : > { %1575 = vmatprep.mubr.f32.mxu0 %v274_v52 }
  0x95   : > { %1576 = vmatmul.mubr.f32.gmra.mrb[28].mxu0 %v275_v53 }
  0x96   : > { %1578 = vmatprep.mubr.f32.mxu0 %v276_v54 }
  0x99   : > { %1579 = vmatmul.mubr.f32.gmra.mrb[30].mxu0 %v277_v55 }
  0x9a   : > { %1581 = vmatprep.mubr.f32.mxu0 %v278_v56 }
  0x9d   : > { %1582 = vmatmul.mubr.f32.gmra.mrb[32].mxu0 %v279_v57 }
  0x9e   : > { %1584 = vmatprep.mubr.f32.mxu0 %v280_v58 }
  0xa1   : > { %1585 = vmatmul.mubr.f32.gmra.mrb[34].mxu0 %v281_v59 }
  0xa2   : > { %1587 = vmatprep.mubr.f32.mxu0 %v282_v60 }
  0xa5   : > { %1588 = vmatmul.mubr.f32.gmra.mrb[36].mxu0 %v283_v61 }
  0xa6   : > { %1590 = vmatprep.mubr.f32.mxu0 %v284_v62 }
  0xa9   : > { %1591 = vmatmul.mubr.f32.gmra.mrb[38].mxu0 %v285_v63 }
  0xaa   : > { %1593 = vmatprep.mubr.f32.mxu0 %v286_v0 }
  0xad   : > { %1594 = vmatmul.mubr.f32.gmra.mrb[40].mxu0 %v287_v1 }
  0xae   : > { %1596 = vmatprep.mubr.f32.mxu0 %v288_v2 }
  0xb1   : > { %1597 = vmatmul.mubr.f32.gmra.mrb[42].mxu0 %v289_v3 }
  0xb2   : > { %1599 = vmatprep.mubr.f32.mxu0 %v290_v4 }
  0xb5   : > { %1600 = vmatmul.mubr.f32.gmra.mrb[44].mxu0 %v291_v5 }
  0xb6   : > { %1602 = vmatprep.mubr.f32.mxu0 %v292_v6 }
  0xb9   : > { %1603 = vmatmul.mubr.f32.gmra.mrb[46].mxu0 %v293_v7 }
  0xba   : > { %1605 = vmatprep.mubr.f32.mxu0 %v294_v8 }
  0xbd   : > { %1606 = vmatmul.mubr.f32.gmra.mrb[48].mxu0 %v295_v9 }
  0xbe   : > { %1608 = vmatprep.mubr.f32.mxu0 %v296_v10 }
  0xc1   : > { %1609 = vmatmul.mubr.f32.gmra.mrb[50].mxu0 %v297_v11 }
  0xc2   : > { %1611 = vmatprep.mubr.f32.mxu0 %v298_v12 }
  0xc5   : > { %1612 = vmatmul.mubr.f32.gmra.mrb[52].mxu0 %v299_v13 }
  0xc6   : > { %1614 = vmatprep.mubr.f32.mxu0 %v300_v14 }
  0xc9   : > { %1615 = vmatmul.mubr.f32.gmra.mrb[54].mxu0 %v301_v15 }
  0xca   : > { %1617 = vmatprep.mubr.f32.mxu0 %v302_v16 }
  0xcd   : > { %1618 = vmatmul.mubr.f32.gmra.mrb[56].mxu0 %v303_v17 }
  0xce   : > { %1620 = vmatprep.mubr.f32.mxu0 %v304_v18 }
  0xd1   : > { %1621 = vmatmul.mubr.f32.gmra.mrb[58].mxu0 %v305_v19 }
  0xd2   : > { %1623 = vmatprep.mubr.f32.mxu0 %v306_v20 }
  0xd5   : > { %1624 = vmatmul.mubr.f32.gmra.mrb[60].mxu0 %v307_v21 }
  0xd6   : > { %1626 = vmatprep.mubr.f32.mxu0 %v308_v22 }
  0xd9   : > { %1627 = vmatmul.mubr.f32.gmra.mrb[62].mxu0 %v309_v23 }
 0x130   : > { %v1535_v26 = vpop.f32.mrb[0].mxu0 }
 0x131   : > { %v405_v27 = vadd.f32 %v1535_v26, %v2194_v25  ;;  %v399_v28 = vpop.f32.mrb[1].mxu0 }
 0x132   : > { %v400_v29 = vadd.f32 %v2194_v25, %v399_v28 }
 0x133   : > { %v719_v30 = vmax.f32 %v405_v27, 0.0 }
 0x134   : > { %v718_v31 = vmax.f32 %v400_v29, 0.0  ;;  %v1538_v32 = vpop.f32.mrb[2].mxu0 }
 0x135   : > { %v415_v33 = vadd.f32 %v1538_v32, %v2194_v25  ;;  %v409_v34 = vpop.f32.mrb[3].mxu0 }
 0x136   : > { %v2199_v35 = vpack.c.bf16 %v719_v30, %v718_v31  ;;  %v410_v36 = vadd.f32 %v2194_v25, %v409_v34 }
 0x137   : > { %v721_v37 = vmax.f32 %v415_v33, 0.0 }
 0x138   : > { %v720_v38 = vmax.f32 %v410_v36, 0.0  ;;  %v1541_v39 = vpop.f32.mrb[4].mxu0 }
 0x139   : > { %v425_v40 = vadd.f32 %v1541_v39, %v2194_v25  ;;  %v419_v41 = vpop.f32.mrb[5].mxu0 }
 0x13a   : > { %v2203_v42 = vpack.c.bf16 %v721_v37, %v720_v38  ;;  %v420_v43 = vadd.f32 %v2194_v25, %v419_v41 }
 0x13b   : > { %v723_v44 = vmax.f32 %v425_v40, 0.0 }
 0x13c   : > { %v722_v45 = vmax.f32 %v420_v43, 0.0  ;;  %v1544_v46 = vpop.f32.mrb[6].mxu0 }
 0x13d   : > { %v435_v47 = vadd.f32 %v1544_v46, %v2194_v25  ;;  %v429_v48 = vpop.f32.mrb[7].mxu0 }
 0x13e   : > { %v2207_v49 = vpack.c.bf16 %v723_v44, %v722_v45  ;;  %v430_v50 = vadd.f32 %v2194_v25, %v429_v48 }
 0x13f   : > { %v725_v51 = vmax.f32 %v435_v47, 0.0 }
 0x140   : > { %v724_v52 = vmax.f32 %v430_v50, 0.0  ;;  %v1547_v53 = vpop.f32.mrb[8].mxu0 }
 0x141   : > { %v445_v54 = vadd.f32 %v1547_v53, %v2194_v25  ;;  %v439_v55 = vpop.f32.mrb[9].mxu0 }
 0x142   : > { %v2211_v56 = vpack.c.bf16 %v725_v51, %v724_v52  ;;  %v440_v57 = vadd.f32 %v2194_v25, %v439_v55 }
 0x143   : > { %v727_v58 = vmax.f32 %v445_v54, 0.0 }
 0x144   : > { %v726_v59 = vmax.f32 %v440_v57, 0.0  ;;  %v1550_v60 = vpop.f32.mrb[10].mxu0 }
 0x145   : > { %v455_v61 = vadd.f32 %v1550_v60, %v2194_v25  ;;  %v449_v62 = vpop.f32.mrb[11].mxu0 }
 0x146   : > { %v2215_v63 = vpack.c.bf16 %v727_v58, %v726_v59  ;;  %v450_v0 = vadd.f32 %v2194_v25, %v449_v62 }
 0x147   : > { %v729_v1 = vmax.f32 %v455_v61, 0.0 }
 0x148   : > { %v728_v2 = vmax.f32 %v450_v0, 0.0  ;;  %v1553_v3 = vpop.f32.mrb[12].mxu0 }
 0x149   : > { %v465_v4 = vadd.f32 %v1553_v3, %v2194_v25  ;;  %v459_v5 = vpop.f32.mrb[13].mxu0 }
 0x14a   : > { %v2219_v6 = vpack.c.bf16 %v729_v1, %v728_v2  ;;  %v460_v7 = vadd.f32 %v2194_v25, %v459_v5 }
 0x14b   : > { %v731_v8 = vmax.f32 %v465_v4, 0.0 }
 0x14c   : > { %v730_v9 = vmax.f32 %v460_v7, 0.0  ;;  %v1556_v10 = vpop.f32.mrb[14].mxu0 }
 0x14d   : > { %v475_v11 = vadd.f32 %v1556_v10, %v2194_v25  ;;  %v469_v12 = vpop.f32.mrb[15].mxu0 }
 0x14e   : > { %v2223_v13 = vpack.c.bf16 %v731_v8, %v730_v9  ;;  %v470_v14 = vadd.f32 %v2194_v25, %v469_v12 }
 0x14f   : > { %v733_v15 = vmax.f32 %v475_v11, 0.0 }
 0x150   : > { %v732_v16 = vmax.f32 %v470_v14, 0.0  ;;  %v1559_v17 = vpop.f32.mrb[16].mxu0 }
 0x151   : > { %v485_v18 = vadd.f32 %v1559_v17, %v2194_v25  ;;  %v479_v19 = vpop.f32.mrb[17].mxu0 }
 0x152   : > { %v2227_v20 = vpack.c.bf16 %v733_v15, %v732_v16  ;;  %v480_v21 = vadd.f32 %v2194_v25, %v479_v19 }
 0x153   : > { %v735_v22 = vmax.f32 %v485_v18, 0.0 }
 0x154   : > { %v734_v23 = vmax.f32 %v480_v21, 0.0  ;;  %v1562_v26 = vpop.f32.mrb[18].mxu0 }
 0x155   : > { %v495_v27 = vadd.f32 %v1562_v26, %v2194_v25  ;;  %v489_v28 = vpop.f32.mrb[19].mxu0 }
 0x156   : > { %v490_v30 = vadd.f32 %v2194_v25, %v489_v28  ;;  %v1661_v31 = vpack.c.bf16 %v735_v22, %v734_v23 }
 0x157   : > { %v737_v32 = vmax.f32 %v495_v27, 0.0 }
 0x158   : > { %v736_v33 = vmax.f32 %v490_v30, 0.0  ;;  %v1565_v34 = vpop.f32.mrb[20].mxu0  ;;  %1663 = vmatprep.subr.msk.bf16.mxu1 %vm2233_vm1, %v1661_v31 }
 0x159   : > { %v505_v36 = vadd.f32 %v1565_v34, %v2194_v25  ;;  %v499_v37 = vpop.f32.mrb[21].mxu0  ;;  %1666 = vmatpush3.bf16.xpose.msk.msra.mxu1 %vm2233_vm1, %v2199_v35 }
 0x15a   : > { %v1667_v38 = vpack.c.bf16 %v737_v32, %v736_v33  ;;  %v500_v39 = vadd.f32 %v2194_v25, %v499_v37 }
 0x15b   : > { %v739_v40 = vmax.f32 %v505_v36, 0.0 }
 0x15c   : > { %v738_v41 = vmax.f32 %v500_v39, 0.0  ;;  %v1568_v43 = vpop.f32.mrb[22].mxu0  ;;  %1669 = vmatprep.subr.msk.bf16.mxu1 %vm2233_vm1, %v1667_v38 }
 0x15d   : > { %v515_v44 = vadd.f32 %v1568_v43, %v2194_v25  ;;  %v509_v45 = vpop.f32.mrb[23].mxu0 }
 0x15e   : > { %v1673_v46 = vpack.c.bf16 %v739_v40, %v738_v41  ;;  %v510_v47 = vadd.f32 %v2194_v25, %v509_v45 }
 0x15f   : > { %v741_v48 = vmax.f32 %v515_v44, 0.0 }
 0x160   : > { %v740_v50 = vmax.f32 %v510_v47, 0.0  ;;  %v1571_v51 = vpop.f32.mrb[24].mxu0 }
 0x161   : > { %v525_v35 = vadd.f32 %v1571_v51, %v2194_v25  ;;  %v519_v52 = vpop.f32.mrb[25].mxu0  ;;  %1672 = vmatpush3.bf16.xpose.msk.msra.mxu1 %vm2233_vm1, %v2203_v42 }
 0x162   : > { %v1679_v53 = vpack.c.bf16 %v741_v48, %v740_v50  ;;  %v520_v54 = vadd.f32 %v2194_v25, %v519_v52  ;;  %1675 = vmatprep.subr.msk.bf16.mxu1 %vm2233_vm1, %v1673_v46 }
 0x163   : > { %v743_v55 = vmax.f32 %v525_v35, 0.0 }
 0x164   : > { %v742_v57 = vmax.f32 %v520_v54, 0.0  ;;  %v1574_v58 = vpop.f32.mrb[26].mxu0 }
 0x165   : > { %v535_v59 = vadd.f32 %v1574_v58, %v2194_v25  ;;  %v529_v60 = vpop.f32.mrb[27].mxu0 }
 0x166   : > { %v1685_v61 = vpack.c.bf16 %v743_v55, %v742_v57  ;;  %v530_v62 = vadd.f32 %v2194_v25, %v529_v60 }
 0x167   : > { %v745_v0 = vmax.f32 %v535_v59, 0.0 }
 0x168   : > { %v744_v1 = vmax.f32 %v530_v62, 0.0  ;;  %v1577_v2 = vpop.f32.mrb[28].mxu0 }
 0x169   : > { %v545_v42 = vadd.f32 %v1577_v2, %v2194_v25  ;;  %v539_v3 = vpop.f32.mrb[29].mxu0  ;;  %1678 = vmatpush3.bf16.xpose.msk.msra.mxu1 %vm2233_vm1, %v2207_v49 }
 0x16a   : > { %v1691_v4 = vpack.c.bf16 %v745_v0, %v744_v1  ;;  %v540_v5 = vadd.f32 %v2194_v25, %v539_v3  ;;  %1681 = vmatprep.subr.msk.bf16.mxu1 %vm2233_vm1, %v1679_v53 }
 0x16b   : > { %v747_v7 = vmax.f32 %v545_v42, 0.0 }
 0x16c   : > { %v746_v8 = vmax.f32 %v540_v5, 0.0  ;;  %v1580_v9 = vpop.f32.mrb[30].mxu0 }
 0x16d   : > { %v555_v10 = vadd.f32 %v1580_v9, %v2194_v25  ;;  %v549_v11 = vpop.f32.mrb[31].mxu0 }
 0x16e   : > { %v1697_v12 = vpack.c.bf16 %v747_v7, %v746_v8  ;;  %v550_v14 = vadd.f32 %v2194_v25, %v549_v11 }
 0x16f   : > { %v749_v15 = vmax.f32 %v555_v10, 0.0 }
 0x170   : > { %v748_v16 = vmax.f32 %v550_v14, 0.0  ;;  %v1583_v17 = vpop.f32.mrb[32].mxu0 }
 0x171   : > { %v565_v49 = vadd.f32 %v1583_v17, %v2194_v25  ;;  %v559_v18 = vpop.f32.mrb[33].mxu0  ;;  %1684 = vmatpush3.bf16.xpose.msk.msra.mxu1 %vm2233_vm1, %v2211_v56 }
 0x172   : > { %v1703_v19 = vpack.c.bf16 %v749_v15, %v748_v16  ;;  %v560_v21 = vadd.f32 %v2194_v25, %v559_v18  ;;  %1687 = vmatprep.subr.msk.bf16.mxu1 %vm2233_vm1, %v1685_v61 }
 0x173   : > { %v751_v22 = vmax.f32 %v565_v49, 0.0 }
 0x174   : > { %v750_v23 = vmax.f32 %v560_v21, 0.0  ;;  %v1586_v26 = vpop.f32.mrb[34].mxu0 }
 0x175   : > { %v575_v27 = vadd.f32 %v1586_v26, %v2194_v25  ;;  %v569_v28 = vpop.f32.mrb[35].mxu0 }
 0x176   : > { %v2275_v30 = vpack.c.bf16 %v751_v22, %v750_v23  ;;  %v570_v31 = vadd.f32 %v2194_v25, %v569_v28 }
 0x177   : > { %v753_v32 = vmax.f32 %v575_v27, 0.0 }
 0x178   : > { %v752_v33 = vmax.f32 %v570_v31, 0.0  ;;  %v1589_v34 = vpop.f32.mrb[36].mxu0 }
 0x179   : > { %v585_v56 = vadd.f32 %v1589_v34, %v2194_v25  ;;  %v579_v36 = vpop.f32.mrb[37].mxu0  ;;  %1690 = vmatpush3.bf16.xpose.msk.msra.mxu1 %vm2233_vm1, %v2215_v63 }
 0x17a   : > { %v2282_v37 = vpack.c.bf16 %v753_v32, %v752_v33  ;;  %v580_v38 = vadd.f32 %v2194_v25, %v579_v36  ;;  %1693 = vmatprep.subr.msk.bf16.mxu1 %vm2233_vm1, %v1691_v4 }
 0x17b   : > { %v755_v39 = vmax.f32 %v585_v56, 0.0 }
 0x17c   : > { %v754_v40 = vmax.f32 %v580_v38, 0.0  ;;  %v1592_v41 = vpop.f32.mrb[38].mxu0 }
 0x17d   : > { %v595_v43 = vadd.f32 %v1592_v41, %v2194_v25  ;;  %v589_v44 = vpop.f32.mrb[39].mxu0 }
 0x17e   : > { %v2288_v45 = vpack.c.bf16 %v755_v39, %v754_v40  ;;  %v590_v46 = vadd.f32 %v2194_v25, %v589_v44 }
 0x17f   : > { %v757_v47 = vmax.f32 %v595_v43, 0.0 }
 0x180   : > { %v756_v48 = vmax.f32 %v590_v46, 0.0  ;;  %v1595_v63 = vpop.f32.mrb[40].mxu0 }
 0x181   : > { %v605_v50 = vadd.f32 %v1595_v63, %v2194_v25  ;;  %v599_v51 = vpop.f32.mrb[41].mxu0  ;;  %1696 = vmatpush3.bf16.xpose.msk.msra.mxu1 %vm2233_vm1, %v2219_v6 }
 0x182   : > { %v2295_v35 = vpack.c.bf16 %v757_v47, %v756_v48  ;;  %v600_v52 = vadd.f32 %v2194_v25, %v599_v51  ;;  %1699 = vmatprep.subr.msk.bf16.mxu1 %vm2233_vm1, %v1697_v12 }
 0x183   : > { %v759_v53 = vmax.f32 %v605_v50, 0.0 }
 0x184   : > { %v758_v54 = vmax.f32 %v600_v52, 0.0  ;;  %v1598_v55 = vpop.f32.mrb[42].mxu0 }
 0x185   : > { %v615_v57 = vadd.f32 %v1598_v55, %v2194_v25  ;;  %v609_v58 = vpop.f32.mrb[43].mxu0 }
 0x186   : > { %v2301_v59 = vpack.c.bf16 %v759_v53, %v758_v54  ;;  %v610_v60 = vadd.f32 %v2194_v25, %v609_v58 }
 0x187   : > { %v761_v61 = vmax.f32 %v615_v57, 0.0 }
 0x188   : > { %v760_v62 = vmax.f32 %v610_v60, 0.0  ;;  %v1601_v6 = vpop.f32.mrb[44].mxu0 }
 0x189   : > { %v625_v0 = vadd.f32 %v1601_v6, %v2194_v25  ;;  %v619_v1 = vpop.f32.mrb[45].mxu0  ;;  %1702 = vmatpush3.bf16.xpose.msk.msra.mxu1 %vm2233_vm1, %v2223_v13 }
 0x18a   : > { %v2308_v2 = vpack.c.bf16 %v761_v61, %v760_v62  ;;  %v620_v42 = vadd.f32 %v2194_v25, %v619_v1  ;;  %1705 = vmatprep.subr.msk.bf16.mxu1 %vm2233_vm1, %v1703_v19 }
 0x18b   : > { %v763_v3 = vmax.f32 %v625_v0, 0.0 }
 0x18c   : > { %v762_v4 = vmax.f32 %v620_v42, 0.0  ;;  %v1604_v5 = vpop.f32.mrb[46].mxu0 }
 0x18d   : > { %v635_v7 = vadd.f32 %v1604_v5, %v2194_v25  ;;  %v629_v8 = vpop.f32.mrb[47].mxu0 }
 0x18e   : > { %v2314_v9 = vpack.c.bf16 %v763_v3, %v762_v4  ;;  %v630_v10 = vadd.f32 %v2194_v25, %v629_v8 }
 0x18f   : > { %v765_v11 = vmax.f32 %v635_v7, 0.0 }
 0x190   : > { %v764_v12 = vmax.f32 %v630_v10, 0.0  ;;  %v1607_v13 = vpop.f32.mrb[48].mxu0 }
 0x191   : > { %v645_v14 = vadd.f32 %v1607_v13, %v2194_v25  ;;  %v639_v15 = vpop.f32.mrb[49].mxu0  ;;  %1708 = vmatpush3.bf16.xpose.msk.msra.mxu1 %vm2233_vm1, %v2227_v20 }
 0x192   : > { %v2321_v16 = vpack.c.bf16 %v765_v11, %v764_v12  ;;  %v640_v17 = vadd.f32 %v2194_v25, %v639_v15 }
 0x193   : > { %v767_v49 = vmax.f32 %v645_v14, 0.0 }
 0x194   : > { %v766_v18 = vmax.f32 %v640_v17, 0.0  ;;  %v1610_v19 = vpop.f32.mrb[50].mxu0 }
 0x195   : > { %v655_v21 = vadd.f32 %v1610_v19, %v2194_v25  ;;  %v649_v22 = vpop.f32.mrb[51].mxu0 }
 0x196   : > { %v1709_v23 = vpack.c.bf16 %v767_v49, %v766_v18  ;;  %v650_v26 = vadd.f32 %v2194_v25, %v649_v22 }
 0x197   : > { %v769_v27 = vmax.f32 %v655_v21, 0.0 }
 0x198   : > { %v768_v28 = vmax.f32 %v650_v26, 0.0  ;;  %1466 = vmatmul.mubr.msk.f32.vlgmr.msra.gmra.mrb[0].mxu1 %vm785_vm0, %v2187_v24  ;;  %1711 = vmatprep.subr.msk.bf16.mxu1 %vm2233_vm1, %v1709_v23  ;;  %v1613_v20 = vpop.f32.mrb[52].mxu0 }
 0x199   : > { %1714 = vmatpush3.bf16.xpose.msk.msra.mxu1 %vm2233_vm1, %v2275_v30  ;;  %v665_v31 = vadd.f32 %v1613_v20, %v2194_v25  ;;  %v659_v32 = vpop.f32.mrb[53].mxu0  ;;  %1499 = vmatprep.mubr.msk.f32.mxu1 %vm785_vm0, %v2187_v24 }
 0x19a   : > { %v1715_v33 = vpack.c.bf16 %v769_v27, %v768_v28  ;;  %v660_v34 = vadd.f32 %v2194_v25, %v659_v32 }
 0x19b   : > { %v771_v56 = vmax.f32 %v665_v31, 0.0 }
 0x19c   : > { %1717 = vmatprep.subr.msk.bf16.mxu1 %vm2233_vm1, %v1715_v33  ;;  %v770_v36 = vmax.f32 %v660_v34, 0.0  ;;  %v1616_v38 = vpop.f32.mrb[54].mxu0  ;;  %v1923_v33 = vmov 1966171168  }
 0x19d   : > { %v675_v39 = vadd.f32 %v1616_v38, %v2194_v25  ;;  %v669_v40 = vpop.f32.mrb[55].mxu0  ;;  %v1154_v34 = vunpack.c.l.s4 %v1923_v33 }
 0x19e   : > { %v1721_v41 = vpack.c.bf16 %v771_v56, %v770_v36  ;;  %v670_v30 = vadd.f32 %v2194_v25, %v669_v40  ;;  %v1156_v56 = vlaneseq }
 0x19f   : > { %v773_v43 = vmax.f32 %v675_v39, 0.0  ;;  %v1155_v36 = vunpack.c.0.s8 %v1154_v34 }
 0x1a0   : > { %v772_v44 = vmax.f32 %v670_v30, 0.0  ;;  %v1619_v46 = vpop.f32.mrb[56].mxu0  ;;  %v1157_v38 = vshrl.u32 %v1156_v56, 7  ;;  %vm1178_vm2 = vcmp.lt.s32.totalorder %v1156_v56, 512 }
 0x1a1   : > { %1720 = vmatpush3.bf16.xpose.msk.msra.mxu1 %vm2233_vm1, %v2282_v37  ;;  %v685_v47 = vadd.f32 %v1619_v46, %v2194_v25  ;;  %v679_v48 = vpop.f32.mrb[57].mxu0 }
 0x1a2   : > { %1723 = vmatprep.subr.msk.bf16.mxu1 %vm2233_vm1, %v1721_v41  ;;  %v1727_v63 = vpack.c.bf16 %v773_v43, %v772_v44  ;;  %v680_v50 = vadd.f32 %v2194_v25, %v679_v48  ;;  %v1158_v40 = vsub.s32 %v1155_v36, %v1157_v38 }
 0x1a3   : > { %v775_v51 = vmax.f32 %v685_v47, 0.0 }
 0x1a4   : > { %v774_v52 = vmax.f32 %v680_v50, 0.0  ;;  %v1622_v53 = vpop.f32.mrb[58].mxu0 }
 0x1a5   : > { %v695_v54 = vadd.f32 %v1622_v53, %v2194_v25  ;;  %v689_v55 = vpop.f32.mrb[59].mxu0 }
 0x1a6   : > { %v1733_v57 = vpack.c.bf16 %v775_v51, %v774_v52  ;;  %v690_v58 = vadd.f32 %v2194_v25, %v689_v55 }
 0x1a7   : > { %v777_v60 = vmax.f32 %v695_v54, 0.0 }
 0x1a8   : > { %v776_v37 = vmax.f32 %v690_v58, 0.0  ;;  %v1625_v61 = vpop.f32.mrb[60].mxu0 }
 0x1a9   : > { %1726 = vmatpush3.bf16.xpose.msk.msra.mxu1 %vm2233_vm1, %v2288_v45  ;;  %v705_v62 = vadd.f32 %v1625_v61, %v2194_v25  ;;  %v699_v6 = vpop.f32.mrb[61].mxu0 }
 0x1aa   : > { %1729 = vmatprep.subr.msk.bf16.mxu1 %vm2233_vm1, %v1727_v63  ;;  %v1739_v0 = vpack.c.bf16 %v777_v60, %v776_v37  ;;  %v700_v1 = vadd.f32 %v2194_v25, %v699_v6 }
 0x1ab   : > { %v779_v42 = vmax.f32 %v705_v62, 0.0 }
 0x1ac   : > { %v778_v3 = vmax.f32 %v700_v1, 0.0  ;;  %v1628_v4 = vpop.f32.mrb[62].mxu0 }
 0x1ad   : > { %v715_v5 = vadd.f32 %v1628_v4, %v2194_v25  ;;  %v709_v7 = vpop.f32.mrb[63].mxu0 }
 0x1ae   : > { %v1745_v8 = vpack.c.bf16 %v779_v42, %v778_v3  ;;  %v710_v10 = vadd.f32 %v2194_v25, %v709_v7  ;;  %v784_v25 = vstv %s783_s26 }
 0x1af   : > { %v781_v11 = vmax.f32 %v715_v5, 0.0 }
 0x1b0   : > { %v780_v45 = vmax.f32 %v710_v10, 0.0 }
 0x1b1   : > { %1732 = vmatpush3.bf16.xpose.msk.msra.mxu1 %vm2233_vm1, %v2295_v35 }
 0x1b2   : > { %1735 = vmatprep.subr.msk.bf16.mxu1 %vm2233_vm1, %v1733_v57  ;;  %v1751_v12 = vpack.c.bf16 %v781_v11, %v780_v45 }
 0x1b9   : > { %1738 = vmatpush3.bf16.xpose.msk.msra.mxu1 %vm2233_vm1, %v2301_v59 }
 0x1ba   : > { %1741 = vmatprep.subr.msk.bf16.mxu1 %vm2233_vm1, %v1739_v0 }
 0x1c1   : > { %1744 = vmatpush3.bf16.xpose.msk.msra.mxu1 %vm2233_vm1, %v2308_v2 }
 0x1c2   : > { %1747 = vmatprep.subr.msk.bf16.mxu1 %vm2233_vm1, %v1745_v8 }
 0x1c9   : > { %1750 = vmatpush3.bf16.xpose.msk.msra.mxu1 %vm2233_vm1, %v2314_v9 }
 0x1ca   : > { %1753 = vmatprep.subr.msk.bf16.mxu1 %vm2233_vm1, %v1751_v12 }
 0x1d1   : > { %1756 = vmatpush3.bf16.xpose.msk.msra.mxu1 %vm2233_vm1, %v2321_v16 }
 0x1d8   : > { %1500 = vmatmul.mubr.msk.f32.vlgmr.msra.gmra.mrb[2].mxu1 %vm785_vm0, %v2187_v24 }
 0x26b   : > { %v1047_v35 = vpop.f32.mrb[0].mxu1 }
 0x26c   : > { %v1048_v59 = vadd.f32 %v1047_v35, %v784_v25  ;;  %v1049_v2 = vpop.f32.mrb[1].mxu1 }
 0x26d   : > { %v1050_v13 = vadd.f32 %v1049_v2, %v784_v25 }
 0x26e   : > { %v1342_v14 = vmul.f32 -1.442695, %v1048_v59 }
 0x26f   : > { %v1343_v15 = vmul.f32 -1.442695, %v1050_v13 }
 0x270   : > { %1806 = vpow2.f32 %v1342_v14 }
 0x271   : > { %1808 = vpow2.f32 %v1343_v15 }
 0x27a   : > { %v1807_v9 = vpop.eup %1806 }
 0x27b   : > { %v1809_v17 = vpop.eup %1808  ;;  %v1135_v49 = vadd.f32 1.0, %v1807_v9 }
 0x27c   : > { %v1136_v18 = vadd.f32 1.0, %v1809_v17 }
 0x27d   : > { %1810 = vrcp.f32 %v1135_v49 }
 0x27e   : > { %1812 = vrcp.f32 %v1136_v18 }
 0x287   : > { %v1811_v29 = vpop.eup %1810 }
 0x288   : > { %v1813_v16 = vpop.eup %1812 }
 0x289   : > { %v1151_v19 = vcombine.low %v1811_v29, %v1813_v16 }
 0x28b   : > { %v1159_v43 = vrot.slane %v1151_v19, %v1158_v40 }
 0x2ab   : > { %v1118_v24 = vpop.f32.mrb[2].mxu1 }
 0x2ac   : > { %v1119_v21 = vadd.f32 %v1118_v24, %v784_v25  ;;  %v1120_v22 = vpop.f32.mrb[3].mxu1 }
 0x2ad   : > { %v1121_v23 = vadd.f32 %v1120_v22, %v784_v25 }
 0x2ae   : > { %v1344_v26 = vmul.f32 -1.442695, %v1119_v21 }
 0x2af   : > { %v1345_v27 = vmul.f32 -1.442695, %v1121_v23 }
 0x2b0   : > { %1814 = vpow2.f32 %v1344_v26 }
 0x2b1   : > { %1816 = vpow2.f32 %v1345_v27 }
 0x2ba   : > { %v1815_v28 = vpop.eup %1814 }
 0x2bb   : > { %v1817_v20 = vpop.eup %1816  ;;  %v1137_v31 = vadd.f32 1.0, %v1815_v28 }
 0x2bc   : > { %v1138_v32 = vadd.f32 1.0, %v1817_v20 }
 0x2bd   : > { %1818 = vrcp.f32 %v1137_v31 }
 0x2be   : > { %1820 = vrcp.f32 %v1138_v32 }
 0x2c7   : > { %v1819_v39 = vpop.eup %1818 }
 0x2c8   : > { %v1821_v41 = vpop.eup %1820 }
 0x2c9   : > { %v1152_v30 = vcombine.low %v1819_v39, %v1821_v41 }
 0x2cb   : > { %v1166_v44 = vrot.slane %v1152_v30, %v1158_v40 }
 0x2cd   : > { %v1167_v46 = vcombine.low %v1159_v43, %v1166_v44 }
 0x2cf   : > { %v1174_v47 = vrot.slane %v1167_v46, %v1158_v40 }
 0x2d1   : > { %1180 = vst.msk [vmem:[%s243_s30] sm:$0xf] %vm1178_vm2, %v1174_v47 }
 0x2d2   : > { %1865 = shalt.err (!%p1862_p2)
}
 0x2d3   : > { %s1866_s18 = scalar_lea.hbm %s2389_s14, 64  ;;  %s1870_s27 = scalar_lea.hbm %s2438_s5, 128 }
 0x2d4   : > { %p1867_p4 = scmp.ne.s32.totalorder %s2389_s14, %s1866_s18  ;;  %p1871_p9 = scmp.lt.u32.totalorder %s2389_s14, %s2438_s5 }
 0x2d5   : > { %p1872_p1 = scmp.lt.u32.totalorder %s1870_s27, %s1866_s18  ;;  %p1874_p6 = scmp.lt.u32.totalorder %s1866_s18, %s2389_s14 }
 0x2d6   : > { %p1868_p5 = pnand %p1867_p4, %p2447_p11 }
 0x2d7   : > { %p1873_p3 = por %p1872_p1, %p1871_p9 }
 0x2d8   : > { %p1869_p7 = pneg %p1868_p5 }
 0x2d9   : > { %p1875_p12 = por %p1874_p6, %p1873_p3 }
 0x2db   : > { %p1876_p13 = pnand %p1875_p12, %p1869_p7 }
 0x2dd   : > { %1879 = shalt.err (!%p1876_p13)
}
 0x2de   : > { %1759 = dma.vmem_to_hbm [thread:$0]  (%p2447_p11), %s2391_s10, 64, %s2389_s14, %s1182_s19  }
 0x2df PF: > { %s1208_s8 = sand.u32 1, %s1906_s20   ;;  %p2448_p8 = scmp.ne.s32.totalorder %s2443_s7, 0 }
 0x2e0   : > { %p2449_p10 = scmp.ge.s32.totalorder %s1918_s23, 2  ;;  %s1209_s9 = scalar_lea.sflag [#allocation5], %s1208_s8 }
 0x2e2   : > { %p1766_p0 = pnand %p2449_p10, %p2448_p8 }
 0x2e4   : > { %1901 = dma.done.wait (!%p1766_p0), %s1209_s9, 64  }
 0x2e5   : > { %1903 = vsyncadd (!%p1766_p0), %s1209_s9, 4294967232  ;;  %p19_p2 = scmp.ge.s32.totalorder %s1983_s25, 4   ;;  %s2450_s20 = smov %s1910_s21 }
 0x2e6   : > { %s2451_s21 = smov %s1914_s22  ;;  %s2452_s22 = smov %s1995_s28 }
 0x2e7   : > { %s2453_s23 = smov %s1983_s25  ;;  %21 = sbr.rel (!%p19_p2) target bundleno = 7 (0x7), region = 85 }
 0x2ee   :  { %1214 = vsyncpa [#allocation4], 1 }
 0x2ef   :  { %1216 = vsyncpa [#allocation4 + $0x1], 1 }
 0x2f0   :  { %1217 = vsyncpa [#allocation5], 1 }
 0x2f1   :  { %1219 = vsyncpa [#allocation5 + $0x1], 1 }

</bundles_post_ra>
